<compile_context>
chip_gen: v7x
topology: tpu7x:2x2x1
jax: 0.10.0
libtpu: 0.0.40
codegen_flags: <defaults>
</compile_context>

<pallas_src>
import jax
import jax.numpy as jnp
from jax.experimental import pallas as pl

N_HIDDEN = 128   # n_hidden in the module
N_PROT   = 16    # small synthetic graph: number of protein nodes
N_GO     = 8     # small synthetic graph: GO terms per ontology (MF/BP/CC)
N_ETYPES = 3     # 'MF-p', 'BP-p', 'CC-p'


def _go2p_kernel(a_ref, hmf_ref, hbp_ref, hcc_ref, w_ref, b_ref, o_ref):
    """Single invocation, two consolidated MXU matmuls.

    a_ref: (3P, 3G)  block-diagonal adjacency  blockdiag(A_MF, A_BP, A_CC)
    h*_ref: (G, D)   GO-term features per ontology
    w_ref: (D, 3D)   weights concatenated along N  [W_MF | W_BP | W_CC]
    b_ref: (3P, D)   per-type bias, pre-broadcast to 16-row blocks
    o_ref: (P, D)    summed, relu'd protein output
    """
    G, D = hmf_ref.shape
    P = o_ref.shape[0]

    # Stack the three GO-feature tiles along sublanes: (3G, D).
    h = jnp.concatenate([hmf_ref[...], hbp_ref[...], hcc_ref[...]], axis=0)

    # Stage 1 — one lane-dense matmul against all three weights at once.
    z = jnp.dot(h, w_ref[...], preferred_element_type=jnp.float32)        # (3G, 3D)

    # Keep only the diagonal (G, D) blocks: row-block t of z against W_t.
    # Slices are (8,128)-tile aligned -> cheap tile copies, no relayout.
    hw = jnp.concatenate(
        [z[t * G:(t + 1) * G, t * D:(t + 1) * D] for t in range(N_ETYPES)],
        axis=0)                                                            # (3G, D)

    # Stage 2 — one block-diagonal matmul does all three aggregations.
    y = jnp.dot(a_ref[...], hw, preferred_element_type=jnp.float32)       # (3P, D)

    # Per-edge-type bias + relu (single VPU pass), then sum the three slabs.
    r = jnp.maximum(y + b_ref[...], 0.0)                                   # (3P, D)
    out = r[0:P] + r[P:2 * P] + r[2 * P:3 * P]                             # (P, D)
    o_ref[...] = out.astype(o_ref.dtype)


def prepare_adjacency(adj):
    """(3, P, G) per-type dense adjacency -> (3P, 3G) block-diagonal.

    Graph structure is fixed; do this once, not per forward call.
    """
    n_e, P, G = adj.shape
    rows = []
    for t in range(n_e):
        blocks = [adj[t] if s == t else jnp.zeros((P, G), adj.dtype)
                  for s in range(n_e)]
        rows.append(jnp.concatenate(blocks, axis=1))
    return jnp.concatenate(rows, axis=0)                                   # (3P, 3G)


def prepare_params(weights, biases, n_prot):
    """Pack weights/biases into the lane-dense layouts the kernel wants.

    weights: (3, D, D), biases: (3, D).  Done once per parameter update,
    not per forward call (layout plumbing, keeps the hot path lean).
    """
    w_cat = jnp.concatenate([weights[t] for t in range(weights.shape[0])],
                            axis=1)                                        # (D, 3D)
    b48 = jnp.repeat(biases, n_prot, axis=0)                               # (3P, D)
    return w_cat, b48


def go_to_p_forward(h_p, h_mf, h_bp, h_cc, a_bd, w_cat, b48):
    """Pallas implementation of GO_to_P.forward.

    h_p:        (P, D)   protein features (unused: no protein self-edge type)
    h_mf/bp/cc: (G, D)   GO-term features per ontology
    a_bd:       (3P, 3G) block-diagonal adjacency (prepare_adjacency)
    w_cat:      (D, 3D)  packed GraphConv weights (prepare_params)
    b48:        (3P, D)  packed GraphConv biases  (prepare_params)
    returns:    (P, D)   updated protein features
    """
    del h_p  # destination features do not enter GraphConv without self-edges
    P = a_bd.shape[0] // N_ETYPES
    G = a_bd.shape[1] // N_ETYPES
    D = w_cat.shape[0]

    flops = 2 * (N_ETYPES * G) * D * (N_ETYPES * D) \
        + 2 * (N_ETYPES * P) * (N_ETYPES * G) * D
    bytes_accessed = 4 * (a_bd.size + 3 * G * D + w_cat.size + b48.size + P * D)

    return pl.pallas_call(
        _go2p_kernel,
        out_shape=jax.ShapeDtypeStruct((P, D), jnp.float32),
        cost_estimate=pl.CostEstimate(flops=flops, transcendentals=0,
                                      bytes_accessed=bytes_accessed),
    )(a_bd, h_mf, h_bp, h_cc, w_cat, b48)


def _reference(h_mf, h_bp, h_cc, adj, weights, biases):
    """Pure-JAX reference with DGL HeteroGraphConv(aggregate='sum') semantics."""
    H = [h_mf, h_bp, h_cc]
    out = jnp.zeros((adj.shape[1], weights.shape[-1]), jnp.float32)
    for t in range(N_ETYPES):
        z = adj[t] @ H[t] @ weights[t] + biases[t][None, :]
        out = out + jnp.maximum(z, 0.0)
    return out


if __name__ == "__main__":
    key = jax.random.PRNGKey(0)
    k = jax.random.split(key, 8)

    # deterministic synthetic parameters (xavier-ish scale) and inputs
    w_scale = (6.0 / (N_HIDDEN + N_HIDDEN)) ** 0.5
    weights = jax.random.uniform(k[0], (N_ETYPES, N_HIDDEN, N_HIDDEN),
                                 jnp.float32, -w_scale, w_scale)
    biases = 0.05 * jax.random.normal(k[6], (N_ETYPES, N_HIDDEN), jnp.float32)

    h_p  = jax.random.normal(k[1], (N_PROT, N_HIDDEN), jnp.float32)
    h_mf = jax.random.normal(k[2], (N_GO,   N_HIDDEN), jnp.float32)
    h_bp = jax.random.normal(k[3], (N_GO,   N_HIDDEN), jnp.float32)
    h_cc = jax.random.normal(k[4], (N_GO,   N_HIDDEN), jnp.float32)

    # dense 0/1 adjacency: GO term g -> protein p edges per ontology
    adj = (jax.random.uniform(k[5], (N_ETYPES, N_PROT, N_GO)) < 0.3).astype(jnp.float32)

    # one-time packing (graph structure + parameters), outside the hot path
    a_bd = prepare_adjacency(adj)                       # (48, 24)
    w_cat, b48 = prepare_params(weights, biases, N_PROT)  # (128, 384), (48, 128)

    out = go_to_p_forward(h_p, h_mf, h_bp, h_cc, a_bd, w_cat, b48)
    out = jax.block_until_ready(out)

    ref = _reference(h_mf, h_bp, h_cc, adj, weights, biases)
    assert out.shape == (N_PROT, N_HIDDEN)
    assert jnp.allclose(out, ref, atol=1e-4, rtol=1e-4)

    print("KERNEL_OK")
</pallas_src>

<mosaic_0001>
module attributes {stable_mosaic.version = 11 : i64} {
  func.func @_go2p_kernel(%arg0: memref<48x24xf32, #tpu.memory_space<vmem>>, %arg1: memref<8x128xf32, #tpu.memory_space<vmem>>, %arg2: memref<8x128xf32, #tpu.memory_space<vmem>>, %arg3: memref<8x128xf32, #tpu.memory_space<vmem>>, %arg4: memref<128x384xf32, #tpu.memory_space<vmem>>, %arg5: memref<48x128xf32, #tpu.memory_space<vmem>>, %arg6: memref<16x128xf32, #tpu.memory_space<vmem>>) attributes {dimension_semantics = [], scalar_prefetch = 0 : i64, scratch_operands = 0 : i64, tpu.core_type = #tpu.core_type<tc>} {
    %c0 = arith.constant 0 : index
    %c0_0 = arith.constant 0 : index
    %0 = vector.load %arg1[%c0, %c0_0] : memref<8x128xf32, #tpu.memory_space<vmem>>, vector<8x128xf32>
    %c0_1 = arith.constant 0 : index
    %c0_2 = arith.constant 0 : index
    %1 = vector.load %arg2[%c0_1, %c0_2] : memref<8x128xf32, #tpu.memory_space<vmem>>, vector<8x128xf32>
    %c0_3 = arith.constant 0 : index
    %c0_4 = arith.constant 0 : index
    %2 = vector.load %arg3[%c0_3, %c0_4] : memref<8x128xf32, #tpu.memory_space<vmem>>, vector<8x128xf32>
    %3 = tpu.concatenate %0, %1, %2 in 0 : vector<8x128xf32>, vector<8x128xf32>, vector<8x128xf32> -> vector<24x128xf32>
    %c0_5 = arith.constant 0 : index
    %c0_6 = arith.constant 0 : index
    %4 = vector.load %arg4[%c0_5, %c0_6] : memref<128x384xf32, #tpu.memory_space<vmem>>, vector<128x384xf32>
    %cst = arith.constant dense<0.000000e+00> : vector<24x384xf32>
    %5 = tpu.matmul %3, %4, %cst {dimension_numbers = #tpu.dot_dimension_numbers<[1], [0], [0], [1], [0, 0, 1, 1], [], []>} : vector<24x128xf32>, vector<128x384xf32>, vector<24x384xf32> -> vector<24x384xf32>
    %6 = vector.extract_strided_slice %5 {offsets = [0, 0], sizes = [8, 128], strides = [1, 1]} : vector<24x384xf32> to vector<8x128xf32>
    %7 = vector.extract_strided_slice %5 {offsets = [8, 128], sizes = [8, 128], strides = [1, 1]} : vector<24x384xf32> to vector<8x128xf32>
    %8 = vector.extract_strided_slice %5 {offsets = [16, 256], sizes = [8, 128], strides = [1, 1]} : vector<24x384xf32> to vector<8x128xf32>
    %9 = tpu.concatenate %6, %7, %8 in 0 : vector<8x128xf32>, vector<8x128xf32>, vector<8x128xf32> -> vector<24x128xf32>
    %c0_7 = arith.constant 0 : index
    %c0_8 = arith.constant 0 : index
    %10 = vector.load %arg0[%c0_7, %c0_8] : memref<48x24xf32, #tpu.memory_space<vmem>>, vector<48x24xf32>
    %cst_9 = arith.constant dense<0.000000e+00> : vector<48x128xf32>
    %11 = tpu.matmul %10, %9, %cst_9 {dimension_numbers = #tpu.dot_dimension_numbers<[1], [0], [0], [1], [0, 0, 1, 1], [], []>} : vector<48x24xf32>, vector<24x128xf32>, vector<48x128xf32> -> vector<48x128xf32>
    %c0_10 = arith.constant 0 : index
    %c0_11 = arith.constant 0 : index
    %12 = vector.load %arg5[%c0_10, %c0_11] : memref<48x128xf32, #tpu.memory_space<vmem>>, vector<48x128xf32>
    %13 = arith.addf %11, %12 : vector<48x128xf32>
    %cst_12 = arith.constant 0.000000e+00 : f32
    %14 = vector.broadcast %cst_12 : f32 to vector<48x128xf32>
    %15 = arith.maximumf %13, %14 : vector<48x128xf32>
    %16 = vector.extract_strided_slice %15 {offsets = [0, 0], sizes = [16, 128], strides = [1, 1]} : vector<48x128xf32> to vector<16x128xf32>
    %17 = vector.extract_strided_slice %15 {offsets = [16, 0], sizes = [16, 128], strides = [1, 1]} : vector<48x128xf32> to vector<16x128xf32>
    %18 = arith.addf %16, %17 : vector<16x128xf32>
    %19 = vector.extract_strided_slice %15 {offsets = [32, 0], sizes = [16, 128], strides = [1, 1]} : vector<48x128xf32> to vector<16x128xf32>
    %20 = arith.addf %18, %19 : vector<16x128xf32>
    %c0_13 = arith.constant 0 : index
    %c0_14 = arith.constant 0 : index
    %21 = vector.load %arg6[%c0_13, %c0_14] : memref<16x128xf32, #tpu.memory_space<vmem>>, vector<16x128xf32>
    tpu.vector_store %arg6[%c0_13, %c0_14], %20 {strides = array<i32>} : memref<16x128xf32, #tpu.memory_space<vmem>>, vector<16x128xf32>,
    return
  }
}

</mosaic_0001>

<bundles_post_ra>
// kernel: tpu_custom_call.1
= control target key start
LH: loop header
LB: loop body
LE: loop exit
PB: predicated region body
PF: predicated region fallthrough
CT: control target
= control target key end

     0   :  { %11 = vsyncpa [#allocation3], 0  ;;  %s748_s0 = inlined_call_operand.vmem [shape: f32[48,24], index: 0, kind: input, shape index: {}]   ;;  %s749_s1 = inlined_call_operand.vmem [shape: f32[8,128], index: 1, kind: input, shape index: {}]   ;;  %s750_s2 = inlined_call_operand.vmem [shape: f32[8,128], index: 2, kind: input, shape index: {}]   ;;  %s751_s3 = inlined_call_operand.vmem [shape: f32[8,128], index: 3, kind: input, shape index: {}]   ;;  %s752_s4 = inlined_call_operand.hbm [shape: f32[128,384], index: 4, kind: input, shape index: {}]   ;;  %s753_s5 = inlined_call_operand.vmem [shape: f32[48,128], index: 5, kind: input, shape index: {}]   ;;  %s754_s6 = inlined_call_operand.hbm [shape: f32[16,128], index: 6, kind: output, shape index: {}]  }
   0x1   :  { %12 = vsyncpa [#allocation4], 0  ;;  %s612_s21 = smov [#allocation2]   ;;  %s564_s25 = scalar_lea.hbm %s752_s4, 6144 }
   0x2   :  { %s26_s22 = sshll.u32 %s612_s21, 4  ;;  %p565_p0 = scmp.ne.s32.totalorder %s752_s4, %s564_s25  ;;  %s27_s22 = int_to_ptr.vmem [resolvable:$true] %s26_s22 }
   0x3   :  { %p568_p1 = scmp.lt.u32.totalorder %s564_s25, %s752_s4 }
   0x5   :  { %p570_p2 = pnand %p568_p1, %p565_p0 }
   0x7   :  { %573 = shalt.err (!%p570_p2)
}
   0x8   :  { %s574_s30 = scalar_lea.vmem %s27_s22, 6144  ;;  %p579_p4 = scmp.lt.s32.totalorder %s27_s22, %s27_s22 }
   0x9   :  { %p575_p3 = scmp.ne.s32.totalorder %s27_s22, %s574_s30  ;;  %p580_p5 = scmp.lt.s32.totalorder %s574_s30, %s574_s30 }
   0xb   :  { %p581_p6 = por %p580_p5, %p579_p4 }
   0xd   :  { %p582_p7 = pnand %p581_p6, %p575_p3 }
   0xf   :  { %585 = shalt.err (!%p582_p7)
}
  0x10   :  { %s613_s7 = smov 384   ;;  %s614_s8 = smov 24  }
  0x11   :  { %32 = dma.hbm_to_vmem [thread:$0]  %s752_s4, 6144, %s27_s22, [#allocation3], %s613_s7, %s613_s7, %s614_s8  }
  0x12   :  { %608 = dma.done.wait [#allocation3], 6144  }
  0x13   :  { %609 = vsyncadd [#allocation3], 4294961152  ;;  %v615_v0 = vmov 0.0|0.0   ;;  %v616_v1 = vmov 0.0   ;;  %vm617_vm0 = vmmov 0   ;;  %v42_v2 = vld [vmem:[#allocation2 + $0x8] sm:$0xff] }
  0x14   :  { %523 = vmatprep.subr.bf16.mxu1 %v615_v0  ;;  %153 = vmatprep.mubr.f32.mxu0 %v616_v1  ;;  %v45_v3 = vld [vmem:[#allocation2 + $0x20] sm:$0xff]  ;;  %v44_v6 = vld [vmem:[#allocation2 + $0x18] sm:$0xff]  ;;  %v51_v8 = vld [vmem:[#allocation2 + $0x50] sm:$0xff]  ;;  %vm258_vm1 = vcmask 195584   ;;  %s618_s11 = smov [#allocation5]  }
  0x15   :  { %467 = vmatprep.mubr.msk.f32.mxu1 %vm617_vm0, %v616_v1  ;;  %v41_v4 = vld [vmem:[#allocation2] sm:$0xff]  ;;  %v491_v5 = vpack.c.bf16 %v45_v3, %v42_v2  ;;  %v48_v7 = vld [vmem:[#allocation2 + $0x38] sm:$0xff]  ;;  %v47_v11 = vld [vmem:[#allocation2 + $0x30] sm:$0xff]  ;;  %s389_s12 = sshll.u32 %s618_s11, 4  ;;  %s390_s12 = int_to_ptr.vmem [resolvable:$true] %s389_s12 }
  0x16   :  { %v493_v9 = vpack.c.bf16 %v44_v6, %v41_v4  ;;  %v495_v10 = vpack.c.bf16 %v51_v8, %v48_v7  ;;  %v50_v12 = vld [vmem:[#allocation2 + $0x48] sm:$0xff]  ;;  %v43_v13 = vld [vmem:[#allocation2 + $0x10] sm:$0xff]  ;;  %v57_v16 = vld [vmem:[#allocation2 + $0x80] sm:$0xff]  ;;  %s586_s13 = scalar_lea.vmem %s390_s12, 256  ;;  %p591_p9 = scmp.lt.s32.totalorder %s390_s12, %s390_s12 }
  0x17   :  { %492 = vmatprep.subr.bf16.mxu0 %v491_v5  ;;  %v46_v14 = vld [vmem:[#allocation2 + $0x28] sm:$0xff]  ;;  %v497_v17 = vpack.c.bf16 %v50_v12, %v47_v11  ;;  %v49_v19 = vld [vmem:[#allocation2 + $0x40] sm:$0xff]  ;;  %v56_v22 = vld [vmem:[#allocation2 + $0x78] sm:$0xff]  ;;  %p587_p8 = scmp.ne.s32.totalorder %s390_s12, %s586_s13  ;;  %p592_p10 = scmp.lt.s32.totalorder %s586_s13, %s586_s13 }
  0x18   :  { %v54_v15 = vld [vmem:[#allocation2 + $0x68] sm:$0xff]  ;;  %494 = vmatpush1.bf16.msra.mxu0 %v493_v9  ;;  %v524_v18 = vpack.c.bf16 %v46_v14, %v43_v13  ;;  %v53_v21 = vld [vmem:[#allocation2 + $0x60] sm:$0xff]  ;;  %v52_v23 = vld [vmem:[#allocation2 + $0x58] sm:$0xff] }
  0x19   :  { %496 = vmatprep.subr.bf16.mxu0 %v495_v10  ;;  %v499_v20 = vpack.c.bf16 %v57_v16, %v54_v15  ;;  %v527_v24 = vpack.c.bf16 %v52_v23, %v49_v19  ;;  %v60_v25 = vld [vmem:[#allocation2 + $0x98] sm:$0xff]  ;;  %v63_v26 = vld [vmem:[#allocation2 + $0xb0] sm:$0xff]  ;;  %v58_v28 = vld [vmem:[#allocation2 + $0x88] sm:$0xff]  ;;  %v501_v29 = vpack.c.bf16 %v56_v22, %v53_v21  ;;  %p593_p11 = por %p592_p10, %p591_p9 }
  0x1a   :  { %525 = vmatpush3.bf16.msra.mxu1 %v524_v18  ;;  %v55_v27 = vld [vmem:[#allocation2 + $0x70] sm:$0xff]  ;;  %v503_v30 = vpack.c.bf16 %v63_v26, %v60_v25  ;;  %v62_v32 = vld [vmem:[#allocation2 + $0xa8] sm:$0xff]  ;;  %v69_v35 = vld [vmem:[#allocation2 + $0xe0] sm:$0xff] }
  0x1b   :  { %526 = vmatprep.subr.bf16.mxu1 %v615_v0  ;;  %v59_v31 = vld [vmem:[#allocation2 + $0x90] sm:$0xff]  ;;  %v530_v33 = vpack.c.bf16 %v58_v28, %v55_v27  ;;  %v66_v34 = vld [vmem:[#allocation2 + $0xc8] sm:$0xff]  ;;  %v61_v36 = vld [vmem:[#allocation2 + $0xa0] sm:$0xff]  ;;  %p594_p12 = pnand %p593_p11, %p587_p8 }
  0x1c   :  { %498 = vmatpush1.bf16.msra.mxu0 %v497_v17  ;;  %v64_v37 = vld [vmem:[#allocation2 + $0xb8] sm:$0xff]  ;;  %v505_v38 = vpack.c.bf16 %v62_v32, %v59_v31  ;;  %v507_v39 = vpack.c.bf16 %v69_v35, %v66_v34  ;;  %v65_v40 = vld [vmem:[#allocation2 + $0xc0] sm:$0xff]  ;;  %v75_v44 = vld [vmem:[#allocation2 + $0x110] sm:$0xff] }
  0x1d   :  { %500 = vmatprep.subr.bf16.mxu0 %v499_v20  ;;  %v68_v41 = vld [vmem:[#allocation2 + $0xd8] sm:$0xff]  ;;  %v533_v42 = vpack.c.bf16 %v64_v37, %v61_v36  ;;  %v67_v45 = vld [vmem:[#allocation2 + $0xd0] sm:$0xff]  ;;  %v70_v46 = vld [vmem:[#allocation2 + $0xe8] sm:$0xff] }
  0x1e   :  { %528 = vmatpush3.bf16.msra.mxu1 %v527_v24  ;;  %v72_v43 = vld [vmem:[#allocation2 + $0xf8] sm:$0xff]  ;;  %v509_v47 = vpack.c.bf16 %v68_v41, %v65_v40  ;;  %v71_v49 = vld [vmem:[#allocation2 + $0xf0] sm:$0xff]  ;;  %v74_v50 = vld [vmem:[#allocation2 + $0x108] sm:$0xff]  ;;  %v536_v51 = vpack.c.bf16 %v70_v46, %v67_v45 }
  0x1f   :  { %529 = vmatprep.subr.bf16.mxu1 %v615_v0  ;;  %v511_v48 = vpack.c.bf16 %v75_v44, %v72_v43  ;;  %v78_v52 = vld [vmem:[#allocation2 + $0x128] sm:$0xff]  ;;  %v81_v53 = vld [vmem:[#allocation2 + $0x140] sm:$0xff]  ;;  %v76_v55 = vld [vmem:[#allocation2 + $0x118] sm:$0xff]  ;;  %v513_v56 = vpack.c.bf16 %v74_v50, %v71_v49 }
  0x20   :  { %502 = vmatpush1.bf16.msra.mxu0 %v501_v29  ;;  %v73_v54 = vld [vmem:[#allocation2 + $0x100] sm:$0xff]  ;;  %v515_v57 = vpack.c.bf16 %v81_v53, %v78_v52  ;;  %v80_v59 = vld [vmem:[#allocation2 + $0x138] sm:$0xff]  ;;  %v87_v62 = vld [vmem:[#allocation2 + $0x170] sm:$0xff] }
  0x21   :  { %504 = vmatprep.subr.bf16.mxu0 %v503_v30  ;;  %v77_v58 = vld [vmem:[#allocation2 + $0x120] sm:$0xff]  ;;  %v539_v60 = vpack.c.bf16 %v76_v55, %v73_v54  ;;  %v84_v61 = vld [vmem:[#allocation2 + $0x158] sm:$0xff]  ;;  %v79_v63 = vld [vmem:[#allocation2 + $0x130] sm:$0xff] }
  0x22   :  { %531 = vmatpush3.bf16.msra.mxu1 %v530_v33  ;;  %v82_v2 = vld [vmem:[#allocation2 + $0x148] sm:$0xff]  ;;  %v517_v3 = vpack.c.bf16 %v80_v59, %v77_v58  ;;  %v519_v4 = vpack.c.bf16 %v87_v62, %v84_v61  ;;  %v83_v5 = vld [vmem:[#allocation2 + $0x150] sm:$0xff]  ;;  %v85_v8 = vld [vmem:[#allocation2 + $0x160] sm:$0xff] }
  0x23   :  { %532 = vmatprep.subr.bf16.mxu1 %v615_v0  ;;  %v86_v6 = vld [vmem:[#allocation2 + $0x168] sm:$0xff]  ;;  %v542_v7 = vpack.c.bf16 %v82_v2, %v79_v63  ;;  %v88_v9 = vld [vmem:[#allocation2 + $0x178] sm:$0xff]  ;;  %v38_v12 = vld [vmem:[%s749_s1] sm:$0xff] }
  0x24   :  { %506 = vmatpush1.bf16.msra.mxu0 %v505_v38  ;;  %v521_v10 = vpack.c.bf16 %v86_v6, %v83_v5  ;;  %v545_v11 = vpack.c.bf16 %v88_v9, %v85_v8  ;;  %v39_v13 = vld [vmem:[%s750_s2] sm:$0xff]  ;;  %v248_v14 = vld [vmem:[%s748_s0 + $0x10] sm:$0xff]  ;;  %v249_v28 = vld [vmem:[%s748_s0 + $0x18] sm:$0xff] }
  0x25   :  { %508 = vmatprep.subr.bf16.mxu0 %v507_v39  ;;  %v246_v15 = vld [vmem:[%s748_s0] sm:$0xff]  ;;  %v247_v29 = vld [vmem:[%s748_s0 + $0x8] sm:$0xff]  ;;  %v255_v33 = vld [vmem:[%s753_s5 + $0x18] sm:$0xff] }
  0x26   :  { %534 = vmatpush3.bf16.msra.mxu1 %v533_v42  ;;  %v250_v30 = vld [vmem:[%s748_s0 + $0x20] sm:$0xff]  ;;  %v251_v31 = vld [vmem:[%s748_s0 + $0x28] sm:$0xff]  ;;  %v254_v35 = vld [vmem:[%s753_s5 + $0x10] sm:$0xff] }
  0x27   :  { %535 = vmatprep.subr.bf16.mxu1 %v615_v0  ;;  %v253_v32 = vld [vmem:[%s753_s5 + $0x8] sm:$0xff]  ;;  %v252_v34 = vld [vmem:[%s753_s5] sm:$0xff] }
  0x28   :  { %510 = vmatpush1.bf16.msra.mxu0 %v509_v47  ;;  %v257_v44 = vld [vmem:[%s753_s5 + $0x28] sm:$0xff]  ;;  %v256_v47 = vld [vmem:[%s753_s5 + $0x20] sm:$0xff] }
  0x29   :  { %512 = vmatprep.subr.bf16.mxu0 %v511_v48 }
  0x2a   :  { %537 = vmatpush3.bf16.msra.mxu1 %v536_v51 }
  0x2b   :  { %538 = vmatprep.subr.bf16.mxu1 %v615_v0 }
  0x2c   :  { %514 = vmatpush1.bf16.msra.mxu0 %v513_v56 }
  0x2d   :  { %516 = vmatprep.subr.bf16.mxu0 %v515_v57 }
  0x2e   :  { %540 = vmatpush3.bf16.msra.mxu1 %v539_v60 }
  0x2f   :  { %541 = vmatprep.subr.bf16.mxu1 %v615_v0 }
  0x30   :  { %518 = vmatpush1.bf16.msra.mxu0 %v517_v3 }
  0x31   :  { %520 = vmatprep.subr.bf16.mxu0 %v519_v4 }
  0x32   :  { %543 = vmatpush3.bf16.msra.mxu1 %v542_v7 }
  0x33   :  { %544 = vmatprep.subr.bf16.mxu1 %v615_v0  ;;  %v40_v0 = vld [vmem:[%s751_s3] sm:$0xff] }
  0x34   :  { %522 = vmatpush1.bf16.msra.mxu0 %v521_v10 }
  0x36   :  { %546 = vmatpush3.bf16.msra.mxu1 %v545_v11 }
  0x37   :  { %154 = vmatmul.mubr.f32.vlgmr.msra.gmra.mrb[0].mxu0 %v38_v12 }
  0x38   :  { %158 = vmatprep.mubr.f32.mxu0 %v616_v1 }
  0x39   :  { %468 = vmatmul.mubr.f32.vlgmr.msra.gmra.mrb[0].mxu1 %v38_v12 }
  0x3a   :  { %470 = vmatprep.mubr.msk.f32.mxu1 %vm617_vm0, %v616_v1 }
  0x3b   :  { %159 = vmatmul.mubr.f32.gmra.mrb[2].mxu0 %v39_v13 }
  0x3c   :  { %163 = vmatprep.mubr.f32.mxu0 %v616_v1 }
  0x3d   :  { %471 = vmatmul.mubr.f32.gmra.mrb[2].mxu1 %v39_v13 }
  0x3e   :  { %473 = vmatprep.mubr.msk.f32.mxu1 %vm617_vm0, %v616_v1 }
  0x3f   :  { %164 = vmatmul.mubr.f32.gmra.mrb[4].mxu0 %v40_v0 }
  0x40   :  { %482 = vmatprep.mubr.msk.f32.mxu0 %vm258_vm1, %v246_v15 }
  0x41   :  { %474 = vmatmul.mubr.f32.gmra.mrb[4].mxu1 %v40_v0 }
  0x42   :  { %485 = vmatprep.mubr.msk.f32.mxu1 %vm258_vm1, %v248_v14 }
 0x10a   :  { %v155_v1 = vpop.f32.mrb[0].mxu0 }
 0x10b   :  { %v157_v16 = vpop.f32.mrb[1].mxu0 }
 0x10c   :  { %v234_v17 = vpop.f32.mrb[0].mxu1 }
 0x10d   :  { %v469_v18 = vpop.f32.mrb[1].mxu1 }
 0x10e   :  { %v160_v19 = vpop.f32.mrb[2].mxu0 }
 0x10f   :  { %v161_v20 = vpop.f32.mrb[3].mxu0 }
 0x110   :  { %v547_v21 = vpack.c.bf16 %v161_v20, %v155_v1  ;;  %v238_v22 = vpop.f32.mrb[2].mxu1 }
 0x111   :  { %v472_v23 = vpop.f32.mrb[3].mxu1 }
 0x112   :  { %548 = vmatprep.subr.bf16.mxu0 %v547_v21  ;;  %551 = vmatprep.subr.bf16.mxu1 %v547_v21  ;;  %v165_v24 = vpop.f32.mrb[4].mxu0 }
 0x113   :  { %550 = vmatpush3.bf16.msra.mxu0 %v547_v21  ;;  %553 = vmatpush3.bf16.msra.mxu1 %v547_v21  ;;  %v166_v25 = vpop.f32.mrb[5].mxu0 }
 0x114   :  { %v242_v26 = vpop.f32.mrb[4].mxu1 }
 0x115   :  { %v475_v27 = vpop.f32.mrb[5].mxu1  ;;  %480 = vmatprep.subr.mxu0 %v242_v26  ;;  %552 = vmatprep.subr.mxu1 %v242_v26 }
 0x117   :  { %481 = vmatpush3.msra.mxu0 %v242_v26  ;;  %554 = vmatpush3.msra.mxu1 %v242_v26 }
 0x118   :  { %486 = vmatmul.mubr.msk.f32.vlgmr.msra.gmra.mrb[6].mxu1 %vm258_vm1, %v249_v28  ;;  %483 = vmatmul.mubr.msk.f32.vlgmr.msra.gmra.mrb[6].mxu0 %vm258_vm1, %v247_v29 }
 0x119   :  { %488 = vmatprep.mubr.msk.f32.mxu1 %vm258_vm1, %v250_v30 }
 0x11c   :  { %489 = vmatmul.mubr.msk.f32.gmra.mrb[8].mxu1 %vm258_vm1, %v251_v31 }
 0x1eb   :  { %v484_v36 = vpop.f32.mrb[6].mxu0  ;;  %v487_v37 = vpop.f32.mrb[6].mxu1 }
 0x1ec   :  { %v349_v38 = vadd.f32 %v484_v36, %v253_v32  ;;  %v359_v39 = vadd.f32 %v487_v37, %v255_v33  ;;  %v343_v40 = vpop.f32.mrb[7].mxu0  ;;  %v353_v41 = vpop.f32.mrb[7].mxu1 }
 0x1ed   :  { %v344_v42 = vadd.f32 %v343_v40, %v252_v34  ;;  %v354_v43 = vadd.f32 %v353_v41, %v254_v35 }
 0x1ee   :  { %v373_v45 = vmax.f32 %v349_v38, 0.0  ;;  %v375_v46 = vmax.f32 %v359_v39, 0.0 }
 0x1ef   :  { %v372_v48 = vmax.f32 %v344_v42, 0.0  ;;  %v374_v49 = vmax.f32 %v354_v43, 0.0  ;;  %v490_v50 = vpop.f32.mrb[8].mxu1 }
 0x1f0   :  { %v379_v51 = vadd.f32 %v375_v46, %v373_v45  ;;  %v369_v52 = vadd.f32 %v490_v50, %v257_v44  ;;  %v363_v53 = vpop.f32.mrb[9].mxu1 }
 0x1f1   :  { %v378_v54 = vadd.f32 %v374_v49, %v372_v48  ;;  %v364_v55 = vadd.f32 %v363_v53, %v256_v47 }
 0x1f2   :  { %v377_v56 = vmax.f32 %v369_v52, 0.0 }
 0x1f3   :  { %v376_v57 = vmax.f32 %v364_v55, 0.0 }
 0x1f4   :  { %v381_v58 = vadd.f32 %v379_v51, %v377_v56 }
 0x1f5   :  { %v380_v59 = vadd.f32 %v378_v54, %v376_v57 }
 0x1f6   :  { %383 = vst [vmem:[#allocation5 + $0x8] sm:$0xff] %v381_v58 }
 0x1f7   :  { %382 = vst [vmem:[#allocation5] sm:$0xff] %v380_v59 }
 0x1f8   :  { %597 = shalt.err (!%p594_p12)
}
 0x1f9   :  { %s598_s14 = scalar_lea.hbm %s754_s6, 256 }
 0x1fa   :  { %p599_p13 = scmp.ne.s32.totalorder %s754_s6, %s598_s14  ;;  %p602_p0 = scmp.lt.u32.totalorder %s598_s14, %s754_s6 }
 0x1fc   :  { %p604_p1 = pnand %p602_p0, %p599_p13 }
 0x1fe   :  { %607 = shalt.err (!%p604_p1)
}
 0x1ff   :  { %s619_s3 = smov 128   ;;  %s620_s18 = smov 8  }
 0x200   :  { %395 = dma.vmem_to_hbm [thread:$0]  %s390_s12, 256, %s754_s6, [#allocation4], %s619_s3, %s619_s3, %s620_s18  }
 0x201   :  { %610 = dma.done.wait [#allocation4], 256  }
 0x202   :  { %611 = vsyncadd [#allocation4], 4294967040 }
 0x203   :  { %399 = vsyncpa [#allocation3], 1 }
 0x204   :  { %400 = vsyncpa [#allocation4], 1 }

</bundles_post_ra>
